<compile_context>
chip_gen: v7x
topology: tpu7x:2x2x1
jax: 0.10.0
libtpu: 0.0.40
codegen_flags: <defaults>
</compile_context>

<pallas_src>
import functools
import math

import jax
import jax.numpy as jnp
from jax.experimental import pallas as pl
from jax.experimental.pallas import tpu as pltpu


_FAST_PATH_BYTES = 1 << 20      # below this, plain JAX/XLA fused add
_MIN_GRID_STEPS = 4             # keep both v7x TensorCores streaming
_MIN_TILE_BYTES = 2 << 20       # never shrink tiles below this for step count


def make_positional_encoding(d_model: int, max_len: int = 5000,
                             dtype=jnp.float32) -> jnp.ndarray:
    """Sin/cos table, identical to the PyTorch __init__ math.

    Returns the PyTorch-shaped buffer (max_len, 1, d_model), pre-cast to the
    model dtype once at init (if dtype is bf16 the table is rounded; this is
    the usual mixed-precision deviation from the f32 PyTorch buffer).
    """
    assert d_model % 2 == 0, "d_model must be even (same limitation as the PyTorch module)"
    position = jnp.arange(0, max_len, dtype=jnp.float32)[:, None]          # (L, 1)
    div_term = jnp.exp(
        jnp.arange(0, d_model, 2, dtype=jnp.float32)
        * (-math.log(10000.0) / d_model)
    )                                                                       # (D/2,)
    pe = jnp.zeros((max_len, d_model), dtype=jnp.float32)
    pe = pe.at[:, 0::2].set(jnp.sin(position * div_term))
    pe = pe.at[:, 1::2].set(jnp.cos(position * div_term))
    return pe[:, None, :].astype(dtype)                                     # (L, 1, D)


def _posenc_kernel_3d(x_ref, pe_ref, o_ref):
    # x_ref: (TS, B, D); pe_ref: (TS, 1, D) -> native sublane broadcast over B.
    o_ref[...] = x_ref[...] + pe_ref[...]


def _posenc_kernel_flat(batch, x_ref, pe_ref, o_ref):
    # x_ref/o_ref: (TS, B*D) lane-dense; pe_ref: (TS, D) tiled across batch
    # on the lane axis (vector-unit work, free under the DMA bound).
    o_ref[...] = x_ref[...] + jnp.tile(pe_ref[...], (1, batch))


@functools.lru_cache(maxsize=1)
def _default_block_bytes() -> int:
    """Target bytes of x per grid step, per TPU generation."""
    try:
        vmem_bytes = int(pltpu.get_tpu_info().vmem_capacity_bytes)
    except Exception:
        vmem_bytes = 0
    # 128 MiB-VMEM parts (v5e/v6e): bigger tiles amortize the ~0.35 us/step
    # overhead.  64 MiB v7x (or unknown): 4 MiB keeps the double-buffered
    # working set small and the grid-step count up for 2-TC sharding.
    return (8 << 20) if vmem_bytes >= (96 << 20) else (4 << 20)


def _choose_block_rows(S: int, row_bytes: int, target_bytes: int,
                       sublane_mult: int, need_align: bool) -> int:
    """Rows of x per grid step."""
    ts = max(1, target_bytes // row_bytes)
    # Prefer >= _MIN_GRID_STEPS grid steps (keeps both v7x TCs busy) as long
    # as tiles stay >= _MIN_TILE_BYTES; costs nothing on single-TC v5e/v6e.
    cap = S // _MIN_GRID_STEPS
    if cap >= 1 and cap * row_bytes >= _MIN_TILE_BYTES:
        ts = min(ts, cap)
    ts = min(int(ts), S)
    if need_align and ts % sublane_mult != 0:
        # Flat path: pe's (ts, D) block needs a sublane-aligned row count
        # (its row dim never equals the full max_len table dim).
        ts = max(sublane_mult, (ts // sublane_mult) * sublane_mult)
    return ts


def positional_encoding_forward(
    x: jnp.ndarray,
    pe: jnp.ndarray,
    *,
    force_pallas: bool = False,
    block_bytes: int | None = None,
    donate_x: bool = False,
) -> jnp.ndarray:
    """x: (S, B, D); pe: (max_len, 1, D) [or (max_len, D)]. Returns x + pe[:S].

    Eval-mode forward of the PyTorch PositionalEncoding (dropout == identity).
    Set donate_x=True when the caller donates x to halve peak HBM residency.
    """
    S, B, D = x.shape
    if pe.ndim == 2:
        pe = pe[:, None, :]                 # unit-dim reshape: free bitcast
    L = pe.shape[0]
    assert S <= L, f"seq_len {S} exceeds max_len {L}"
    assert pe.shape[2] == D, f"d_model mismatch: x has {D}, pe has {pe.shape[2]}"
    if pe.dtype != x.dtype:
        # Fallback only; prefer building the table in x.dtype at init
        # (make_positional_encoding(dtype=...)) so no per-call cast pass.
        pe = pe.astype(x.dtype)

    itemsize = jnp.dtype(x.dtype).itemsize
    total_bytes = x.size * itemsize
    if not force_pallas and total_bytes < _FAST_PATH_BYTES:
        # Tiny input: plain JAX/XLA, fused into neighbors for free.
        return x + pe[:S]

    if block_bytes is None:
        block_bytes = _default_block_bytes()

    sublane_mult = 8 * max(1, 4 // itemsize)          # f32:8, bf16:16, int8:32
    # Lane-dense output is the biggest measured lever: flatten (B, D) -> B*D
    # when D alone is not a multiple of 128 but B*D is.
    use_flat = (D % 128 != 0) and ((B * D) % 128 == 0) and (S >= sublane_mult)

    row_bytes = B * D * itemsize
    ts = _choose_block_rows(S, row_bytes, block_bytes, sublane_mult, use_flat)
    grid = (pl.cdiv(S, ts),)

    # VMEM: double-buffered x-in + out + pe tiles, plus headroom.  No 32 MiB
    # floor -- request only what the working set needs (v7x has 64 MiB total),
    # capped at 48 MiB; 16 MiB floor is <= every generation's default.
    tile_bytes = ts * row_bytes
    pe_tile_bytes = ts * D * itemsize
    vmem_bytes = 2 * (2 * tile_bytes + pe_tile_bytes) + (4 << 20)
    vmem_limit = int(min(max(vmem_bytes, 16 << 20), 48 << 20))

    io_aliases = {0: 0} if donate_x else {}

    if use_flat:
        kernel = functools.partial(_posenc_kernel_flat, B)
        x_in = x.reshape(S, B * D)                    # free bitcast reshape
        pe_in = pe.reshape(L, D)                      # free bitcast reshape
        in_specs = [
            pl.BlockSpec((ts, B * D), lambda i: (i, 0)),   # x tile (lane-dense)
            pl.BlockSpec((ts, D), lambda i: (i, 0)),       # pe rows (co-tiled)
        ]
        out_spec = pl.BlockSpec((ts, B * D), lambda i: (i, 0))
        out_shape = jax.ShapeDtypeStruct((S, B * D), x.dtype)
    else:
        kernel = _posenc_kernel_3d
        x_in = x
        pe_in = pe
        in_specs = [
            pl.BlockSpec((ts, B, D), lambda i: (i, 0, 0)),  # x tile
            pl.BlockSpec((ts, 1, D), lambda i: (i, 0, 0)),  # pe rows (co-tiled)
        ]
        out_spec = pl.BlockSpec((ts, B, D), lambda i: (i, 0, 0))
        out_shape = jax.ShapeDtypeStruct((S, B, D), x.dtype)

    out = pl.pallas_call(
        kernel,
        out_shape=out_shape,
        grid_spec=pltpu.PrefetchScalarGridSpec(
            num_scalar_prefetch=0,
            grid=grid,
            in_specs=in_specs,
            out_specs=out_spec,
        ),
        input_output_aliases=io_aliases,
        compiler_params=pltpu.CompilerParams(
            dimension_semantics=("parallel",),   # lets v7x shard seq axis over 2 TCs
            vmem_limit_bytes=vmem_limit,
        ),
    )(x_in, pe_in)

    return out.reshape(S, B, D) if use_flat else out


if __name__ == "__main__":
    key = jax.random.PRNGKey(0)
    k0, k1, k2 = jax.random.split(key, 3)

    # --- Small shapes consistent with the module: seq=8, batch=2, d_model=32 ---
    S, B, D = 8, 2, 32
    x = jax.random.normal(k0, (S, B, D), dtype=jnp.float32)
    pe = make_positional_encoding(D, max_len=5000)          # (5000, 1, 32)
    ref = x + pe[:S]

    # 1) Default entry point: tiny input takes the fused plain-JAX fast path.
    out_fast = jax.block_until_ready(positional_encoding_forward(x, pe))
    assert out_fast.shape == (S, B, D)
    assert jnp.allclose(out_fast, ref, atol=1e-6), "fast-path mismatch vs. reference"

    # 2) Force the Pallas kernel (3-D layout path) on the same small shapes.
    out_pallas = jax.block_until_ready(
        positional_encoding_forward(x, pe, force_pallas=True)
    )
    assert jnp.allclose(out_pallas, ref, atol=1e-6), "pallas 3-D mismatch vs. reference"

    # 3) Flat lane-dense path: D=64 is not a multiple of 128 but B*D=256 is.
    S3, B3, D3 = 64, 4, 64
    x3 = jax.random.normal(k2, (S3, B3, D3), dtype=jnp.float32)
    pe3 = make_positional_encoding(D3, max_len=5000)
    out3 = jax.block_until_ready(
        positional_encoding_forward(x3, pe3, force_pallas=True)
    )
    ref3 = x3 + pe3[:S3]
    assert jnp.allclose(out3, ref3, atol=1e-6), "pallas flat mismatch vs. reference"

    # 4) Larger, lane-dense shape exercising the multi-step tiled grid path.
    S2, B2, D2 = 1024, 8, 128
    x2 = jax.random.normal(k1, (S2, B2, D2), dtype=jnp.float32)
    pe2 = make_positional_encoding(D2, max_len=5000)
    out2 = jax.block_until_ready(
        positional_encoding_forward(x2, pe2, block_bytes=1 << 20)
    )
    ref2 = x2 + pe2[:S2]
    assert jnp.allclose(out2, ref2, atol=1e-6), "tiled pallas mismatch vs. reference"

    print("KERNEL_OK")
</pallas_src>

<mosaic_0001>
module attributes {stable_mosaic.version = 11 : i64} {
  func.func @_posenc_kernel_3d(%arg0: i32, %arg1: memref<8x2x32xf32, #tpu.memory_space<vmem>>, %arg2: memref<8x1x32xf32, #tpu.memory_space<vmem>>, %arg3: memref<8x2x32xf32, #tpu.memory_space<vmem>>) attributes {dimension_semantics = [#tpu.dimension_semantics<parallel>], iteration_bounds = array<i64: 1>, scalar_prefetch = 0 : i64, scratch_operands = 0 : i64, tpu.core_type = #tpu.core_type<tc>, window_params = [{transform_indices = @transform_0, window_bounds = array<i64: 8, 2, 32>}, {transform_indices = @transform_1, window_bounds = array<i64: 8, 1, 32>}, {transform_indices = @transform_2, window_bounds = array<i64: 8, 2, 32>}]} {
    %c0 = arith.constant 0 : index
    %c0_0 = arith.constant 0 : index
    %c0_1 = arith.constant 0 : index
    %0 = vector.load %arg1[%c0, %c0_0, %c0_1] : memref<8x2x32xf32, #tpu.memory_space<vmem>>, vector<8x2x32xf32>
    %c0_2 = arith.constant 0 : index
    %c0_3 = arith.constant 0 : index
    %c0_4 = arith.constant 0 : index
    %1 = vector.load %arg2[%c0_2, %c0_3, %c0_4] : memref<8x1x32xf32, #tpu.memory_space<vmem>>, vector<8x1x32xf32>
    %2 = vector.broadcast %1 : vector<8x1x32xf32> to vector<8x2x32xf32>
    %3 = arith.addf %0, %2 : vector<8x2x32xf32>
    %c0_5 = arith.constant 0 : index
    %c0_6 = arith.constant 0 : index
    %c0_7 = arith.constant 0 : index
    %4 = vector.load %arg3[%c0_5, %c0_6, %c0_7] : memref<8x2x32xf32, #tpu.memory_space<vmem>>, vector<8x2x32xf32>
    tpu.vector_store %arg3[%c0_5, %c0_6, %c0_7], %3 {strides = array<i32>} : memref<8x2x32xf32, #tpu.memory_space<vmem>>, vector<8x2x32xf32>,
    return
  }
  func.func @transform_0(%arg0: i32) -> (i32, i32, i32) {
    %c0_i32 = arith.constant 0 : i32
    %c0_i32_0 = arith.constant 0 : i32
    %c0_i32_1 = arith.constant 0 : i32
    return %arg0, %c0_i32, %c0_i32_0 : i32, i32, i32
  }
  func.func @transform_1(%arg0: i32) -> (i32, i32, i32) {
    %c0_i32 = arith.constant 0 : i32
    %c0_i32_0 = arith.constant 0 : i32
    %c0_i32_1 = arith.constant 0 : i32
    return %arg0, %c0_i32, %c0_i32_0 : i32, i32, i32
  }
  func.func @transform_2(%arg0: i32) -> (i32, i32, i32) {
    %c0_i32 = arith.constant 0 : i32
    %c0_i32_0 = arith.constant 0 : i32
    %c0_i32_1 = arith.constant 0 : i32
    return %arg0, %c0_i32, %c0_i32_0 : i32, i32, i32
  }
}

</mosaic_0001>

<bundles_post_ra>
// kernel: tpu_custom_call.1
= control target key start
LH: loop header
LB: loop body
LE: loop exit
PB: predicated region body
PF: predicated region fallthrough
CT: control target
= control target key end

     0   :  { %vm84_vm0 = vcmask 254976   ;;  %s230_s0 = inlined_call_operand.vmem [shape: f32[8,2,32], index: 0, kind: input, shape index: {}]   ;;  %s231_s1 = inlined_call_operand.vmem [shape: f32[5000,1,32], index: 1, kind: input, shape index: {}]   ;;  %s232_s2 = inlined_call_operand.hbm [shape: f32[8,2,32], index: 2, kind: output, shape index: {}]  }
   0x1   :  { %v12_v0 = vld [vmem:[%s230_s0] sm:$0x3]  ;;  %v13_v3 = vld [vmem:[%s230_s0 + $0x2] sm:$0x3]  ;;  %v14_v5 = vld [vmem:[%s230_s0 + $0x4] sm:$0x3] }
   0x2   :  { %v109_v1 = vld [vmem:[%s231_s1] ss:$0 sm:$0xff]  ;;  %v110_v4 = vld [vmem:[%s231_s1 + $0x1] ss:$0 sm:$0xff]  ;;  %v111_v7 = vld [vmem:[%s231_s1 + $0x2] ss:$0 sm:$0xff] }
   0x3   :  { %v76_v2 = vadd.f32 %v109_v1, %v12_v0  ;;  %v77_v6 = vadd.f32 %v110_v4, %v13_v3  ;;  %v15_v8 = vld [vmem:[%s230_s0 + $0x6] sm:$0x3]  ;;  %v112_v9 = vld [vmem:[%s231_s1 + $0x3] ss:$0 sm:$0xff]  ;;  %v78_v10 = vadd.f32 %v111_v7, %v14_v5  ;;  %v16_v12 = vld [vmem:[%s230_s0 + $0x8] sm:$0x3] }
   0x4   :  { %v79_v11 = vadd.f32 %v112_v9, %v15_v8  ;;  %v113_v13 = vld [vmem:[%s231_s1 + $0x4] ss:$0 sm:$0xff]  ;;  %v17_v14 = vld [vmem:[%s230_s0 + $0xa] sm:$0x3]  ;;  %v114_v16 = vld [vmem:[%s231_s1 + $0x5] ss:$0 sm:$0xff] }
   0x5   :  { %85 = vst.msk [vmem:[#allocation2] sm:$0x3] %vm84_vm0, %v76_v2  ;;  %86 = vst.msk [vmem:[#allocation2 + $0x2] sm:$0x3] %vm84_vm0, %v77_v6  ;;  %v80_v15 = vadd.f32 %v113_v13, %v16_v12  ;;  %v18_v17 = vld [vmem:[%s230_s0 + $0xc] sm:$0x3]  ;;  %v81_v19 = vadd.f32 %v114_v16, %v17_v14 }
   0x6   :  { %v115_v18 = vld [vmem:[%s231_s1 + $0x6] ss:$0 sm:$0xff]  ;;  %87 = vst.msk [vmem:[#allocation2 + $0x4] sm:$0x3] %vm84_vm0, %v78_v10  ;;  %88 = vst.msk [vmem:[#allocation2 + $0x6] sm:$0x3] %vm84_vm0, %v79_v11 }
   0x7   :  { %v82_v20 = vadd.f32 %v115_v18, %v18_v17  ;;  %v19_v21 = vld [vmem:[%s230_s0 + $0xe] sm:$0x3]  ;;  %v116_v22 = vld [vmem:[%s231_s1 + $0x7] ss:$0 sm:$0xff] }
   0x8   :  { %7 = vsyncpa [#allocation3], 0  ;;  %89 = vst.msk [vmem:[#allocation2 + $0x8] sm:$0x3] %vm84_vm0, %v80_v15  ;;  %v83_v23 = vadd.f32 %v116_v22, %v19_v21  ;;  %s144_s13 = smov [#allocation2]  }
   0x9   :  { %s98_s14 = sshll.u32 %s144_s13, 4  ;;  %90 = vst.msk [vmem:[#allocation2 + $0xa] sm:$0x3] %vm84_vm0, %v81_v19  ;;  %91 = vst.msk [vmem:[#allocation2 + $0xc] sm:$0x3] %vm84_vm0, %v82_v20  ;;  %s99_s14 = int_to_ptr.vmem [resolvable:$true] %s98_s14 }
   0xa   :  { %92 = vst.msk [vmem:[#allocation2 + $0xe] sm:$0x3] %vm84_vm0, %v83_v23  ;;  %s120_s15 = scalar_lea.vmem %s99_s14, 256  ;;  %p125_p1 = scmp.lt.s32.totalorder %s99_s14, %s99_s14 }
   0xb   :  { %p121_p0 = scmp.ne.s32.totalorder %s99_s14, %s120_s15  ;;  %p126_p2 = scmp.lt.s32.totalorder %s120_s15, %s120_s15 }
   0xd   :  { %p127_p3 = por %p126_p2, %p125_p1 }
   0xf   :  { %p128_p4 = pnand %p127_p3, %p121_p0 }
  0x11   :  { %131 = shalt.err (!%p128_p4)
}
  0x12   :  { %s132_s16 = scalar_lea.hbm %s232_s2, 256 }
  0x13   :  { %p133_p5 = scmp.ne.s32.totalorder %s232_s2, %s132_s16  ;;  %p136_p6 = scmp.lt.u32.totalorder %s132_s16, %s232_s2 }
  0x15   :  { %p138_p7 = pnand %p136_p6, %p133_p5 }
  0x17   :  { %141 = shalt.err (!%p138_p7)
}
  0x18   :  { %s145_s21 = smov 32   ;;  %s146_s22 = smov 2  }
  0x19   :  { %104 = dma.vmem_to_hbm [thread:$0]  %s99_s14, 256, %s232_s2, [#allocation3], %s145_s21, %s145_s21, %s146_s22  }
  0x1a   :  { %142 = dma.done.wait [#allocation3], 256  }
  0x1b   :  { %143 = vsyncadd [#allocation3], 4294967040 }
  0x1c   :  { %108 = vsyncpa [#allocation3], 1 }

</bundles_post_ra>
